<compile_context>
chip_gen: v6e
topology: v6e:2x2x1
jax: 0.10.0
libtpu: 0.0.40
codegen_flags: <defaults>
</compile_context>

<pallas_src>
import math
from functools import partial

import jax
import jax.numpy as jnp
from jax import lax
from jax.experimental import pallas as pl
from jax.experimental.pallas import tpu as pltpu


def _pick_tile(length, pref):
    """Largest multiple-of-8 tile <= pref that divides `length` (or full length)."""
    if length <= pref:
        return length
    for t in range(pref, 7, -8):
        if length % t == 0:
            return t
    return length


# -----------------------------------------------------------------------------
# Fused multi-head attention kernel: one grid step = one tile of output rows.
# -----------------------------------------------------------------------------
def _fused_mha_kernel(xq_ref, xkv_ref, wq_ref, wk_ref, wv_ref, wfct_ref, o_ref,
                      *, num_head, scale):
    # xq_ref   : (tq, F)  q-row tile of the input
    # xkv_ref  : (S,  F)  full input (source of K and V), resident across steps
    # wq/wk/wv : (F,  F)  nn.Linear weights, (out_features, in_features)
    # wfct_ref : (F,  F)  fc weight pre-transposed to (in_features, out_features)
    # o_ref    : (tq, F)  lane-dense output tile
    F = xq_ref.shape[-1]
    d_k = F // num_head

    def nt(a, w):
        # a @ w.T : contract the last dims of both operands (MXU NT matmul,
        # no materialized transpose / XLU work on the weight tile).
        return lax.dot_general(
            a, w,
            dimension_numbers=(((1,), (1,)), ((), ())),
            preferred_element_type=jnp.float32,
        )

    # Fold 1/sqrt(d_k) into the Q input rows once (tq*F muls total).
    xq = xq_ref[...].astype(jnp.float32) * scale
    xkv = xkv_ref[...]

    out_acc = jnp.zeros(o_ref.shape, jnp.float32)

    # Static head loop; every slice below is a sublane-dim (8-aligned) window
    # of a resident weight block, so no lane-offset slicing is needed and the
    # output store stays a single lane-dense slab.
    for h in range(num_head):
        r0, r1 = h * d_k, (h + 1) * d_k

        q_h = nt(xq, wq_ref[r0:r1, :].astype(jnp.float32))   # (tq, d_k), pre-scaled
        k_h = nt(xkv, wk_ref[r0:r1, :])                      # (S,  d_k)
        v_h = nt(xkv, wv_ref[r0:r1, :])                      # (S,  d_k)

        # scores = Q_h @ K_h^T, contracting d_k directly
        scores = nt(q_h, k_h)                                # (tq, S) f32

        # numerically stable softmax along S
        m = jnp.max(scores, axis=-1, keepdims=True)
        e = jnp.exp(scores - m)
        denom = jnp.sum(e, axis=-1, keepdims=True)
        attn = e * pl.reciprocal(denom, approx=False)        # exact reciprocal
        # TODO(synk): nn.Dropout(0.5) on attn is identity in eval mode; training
        # dropout would use pltpu.prng_seed + pltpu.prng_random_bits here.

        y_h = jnp.dot(attn, v_h, preferred_element_type=jnp.float32)   # (tq, d_k)

        # fc contribution of this head:
        #   y_h @ Wfc[:, r0:r1]^T  ==  y_h @ WfcT[r0:r1, :]
        out_acc = out_acc + jnp.dot(
            y_h, wfct_ref[r0:r1, :].astype(jnp.float32),
            preferred_element_type=jnp.float32)

    # TODO(synk): trailing nn.Dropout(0.5) in fc is identity in eval mode.
    o_ref[...] = out_acc.astype(o_ref.dtype)


# -----------------------------------------------------------------------------
# Full AttentionExtractor forward (single fused pallas_call).
# -----------------------------------------------------------------------------
def attention_extractor_forward(x, wq, wk, wv, wfc, *, num_head, tq_pref=256):
    """x: (1, S, F); wq/wk/wv/wfc: (F, F) nn.Linear weights (out_features, in_features)."""
    B, S, F = x.shape
    assert B == 1, "module's head reshapes hard-code batch=1"
    assert F % num_head == 0
    d_k = F // num_head
    scale = 1.0 / math.sqrt(d_k)

    x2 = x.reshape(S, F)
    # One wrapper-side transpose of a weight (done once, outside the hot loop):
    # lets the kernel slice fc rows per head (sublane-aligned) and keep the
    # output store lane-dense with no in-kernel concatenate.
    wfct = wfc.T

    tq = _pick_tile(S, tq_pref)
    grid = (S // tq,)
    # TODO(synk): for very long sequences add a flash-style (arbitrary) Lk grid
    # axis with online-softmax accumulators instead of full (S,F) K/V per step.

    kernel = partial(_fused_mha_kernel, num_head=num_head, scale=scale)

    out = pl.pallas_call(
        kernel,
        out_shape=jax.ShapeDtypeStruct((S, F), x.dtype),
        grid_spec=pltpu.PrefetchScalarGridSpec(
            num_scalar_prefetch=0,
            grid=grid,
            in_specs=[
                pl.BlockSpec((tq, F), lambda i: (i, 0)),   # q-row tile of x
                pl.BlockSpec((S, F), lambda i: (0, 0)),    # full x for K/V (resident)
                pl.BlockSpec((F, F), lambda i: (0, 0)),    # Wq   (resident)
                pl.BlockSpec((F, F), lambda i: (0, 0)),    # Wk   (resident)
                pl.BlockSpec((F, F), lambda i: (0, 0)),    # Wv   (resident)
                pl.BlockSpec((F, F), lambda i: (0, 0)),    # Wfc^T (resident)
            ],
            out_specs=pl.BlockSpec((tq, F), lambda i: (i, 0)),
        ),
        compiler_params=pltpu.CompilerParams(
            # single independent grid axis -> megacore sharding on v7x;
            # default scoped-VMEM limit (16/32 MiB) is ample for the ~300 KB
            # working set at F=128, so no vmem_limit_bytes override.
            dimension_semantics=("parallel",),
        ),
    )(x2, x2, wq, wk, wv, wfct)
    return out.reshape(1, S, F)


# -----------------------------------------------------------------------------
# Pure-JAX reference.
# -----------------------------------------------------------------------------
def _reference(x, wq, wk, wv, wfc, num_head):
    B, S, F = x.shape
    d_k = F // num_head
    q = x[0] @ wq.T
    k = x[0] @ wk.T
    v = x[0] @ wv.T
    to_heads = lambda t: t.reshape(S, num_head, d_k).transpose(1, 0, 2)
    qh, kh, vh = to_heads(q), to_heads(k), to_heads(v)
    scores = jnp.einsum("hqd,hkd->hqk", qh, kh) / math.sqrt(d_k)
    attn = jax.nn.softmax(scores, axis=-1)
    y = jnp.einsum("hqk,hkd->hqd", attn, vh)
    y = y.transpose(1, 0, 2).reshape(S, F)
    return (y @ wfc.T).reshape(1, S, F)


if __name__ == "__main__":
    key = jax.random.PRNGKey(0)
    kx, k1, k2, k3, k4 = jax.random.split(key, 5)

    num_head, num_feature, seq_len = 4, 128, 16
    w_scale = 1.0 / math.sqrt(num_feature)

    x = jax.random.normal(kx, (1, seq_len, num_feature), dtype=jnp.float32)
    wq = jax.random.normal(k1, (num_feature, num_feature), jnp.float32) * w_scale
    wk = jax.random.normal(k2, (num_feature, num_feature), jnp.float32) * w_scale
    wv = jax.random.normal(k3, (num_feature, num_feature), jnp.float32) * w_scale
    wfc = jax.random.normal(k4, (num_feature, num_feature), jnp.float32) * w_scale

    out = attention_extractor_forward(x, wq, wk, wv, wfc, num_head=num_head)
    out = jax.block_until_ready(out)

    ref = _reference(x, wq, wk, wv, wfc, num_head)
    assert out.shape == ref.shape, f"shape mismatch {out.shape} vs {ref.shape}"
    assert jnp.allclose(out, ref, atol=2e-3, rtol=2e-3), "output mismatch"

    print("KERNEL_OK")
</pallas_src>

<mosaic_0001>
module attributes {stable_mosaic.version = 11 : i64} {
  func.func @_fused_mha_kernel(%arg0: i32, %arg1: memref<16x128xf32, #tpu.memory_space<vmem>>, %arg2: memref<16x128xf32, #tpu.memory_space<vmem>>, %arg3: memref<128x128xf32, #tpu.memory_space<vmem>>, %arg4: memref<128x128xf32, #tpu.memory_space<vmem>>, %arg5: memref<128x128xf32, #tpu.memory_space<vmem>>, %arg6: memref<128x128xf32, #tpu.memory_space<vmem>>, %arg7: memref<16x128xf32, #tpu.memory_space<vmem>>) attributes {dimension_semantics = [#tpu.dimension_semantics<parallel>], iteration_bounds = array<i64: 1>, scalar_prefetch = 0 : i64, scratch_operands = 0 : i64, tpu.core_type = #tpu.core_type<tc>, window_params = [{transform_indices = @transform_0, window_bounds = array<i64: 16, 128>}, {pipeline_mode = #tpu.pipeline_mode<synchronous>, transform_indices = @transform_1, window_bounds = array<i64: 16, 128>}, {pipeline_mode = #tpu.pipeline_mode<synchronous>, transform_indices = @transform_2, window_bounds = array<i64: 128, 128>}, {pipeline_mode = #tpu.pipeline_mode<synchronous>, transform_indices = @transform_3, window_bounds = array<i64: 128, 128>}, {pipeline_mode = #tpu.pipeline_mode<synchronous>, transform_indices = @transform_4, window_bounds = array<i64: 128, 128>}, {pipeline_mode = #tpu.pipeline_mode<synchronous>, transform_indices = @transform_5, window_bounds = array<i64: 128, 128>}, {transform_indices = @transform_6, window_bounds = array<i64: 16, 128>}]} {
    %c0 = arith.constant 0 : index
    %c0_0 = arith.constant 0 : index
    %0 = vector.load %arg1[%c0, %c0_0] : memref<16x128xf32, #tpu.memory_space<vmem>>, vector<16x128xf32>
    %cst = arith.constant 0.176776692 : f32
    %1 = vector.broadcast %cst : f32 to vector<16x128xf32>
    %2 = arith.mulf %0, %1 : vector<16x128xf32>
    %c0_1 = arith.constant 0 : index
    %c0_2 = arith.constant 0 : index
    %3 = vector.load %arg2[%c0_1, %c0_2] : memref<16x128xf32, #tpu.memory_space<vmem>>, vector<16x128xf32>
    %cst_3 = arith.constant 0.000000e+00 : f32
    %4 = vector.broadcast %cst_3 : f32 to vector<16x128xf32>
    %c0_4 = arith.constant 0 : index
    %c0_5 = arith.constant 0 : index
    %5 = vector.load %arg3[%c0_4, %c0_5] : memref<128x128xf32, #tpu.memory_space<vmem>>, vector<32x128xf32>
    %cst_6 = arith.constant dense<0.000000e+00> : vector<16x32xf32>
    %6 = tpu.matmul %2, %5, %cst_6 {dimension_numbers = #tpu.dot_dimension_numbers<[1], [1], [0], [0], [0, 0, 1, 0], [], []>} : vector<16x128xf32>, vector<32x128xf32>, vector<16x32xf32> -> vector<16x32xf32>
    %c0_7 = arith.constant 0 : index
    %c0_8 = arith.constant 0 : index
    %7 = vector.load %arg4[%c0_7, %c0_8] : memref<128x128xf32, #tpu.memory_space<vmem>>, vector<32x128xf32>
    %cst_9 = arith.constant dense<0.000000e+00> : vector<16x32xf32>
    %8 = tpu.matmul %3, %7, %cst_9 {dimension_numbers = #tpu.dot_dimension_numbers<[1], [1], [0], [0], [0, 0, 1, 0], [], []>} : vector<16x128xf32>, vector<32x128xf32>, vector<16x32xf32> -> vector<16x32xf32>
    %c0_10 = arith.constant 0 : index
    %c0_11 = arith.constant 0 : index
    %9 = vector.load %arg5[%c0_10, %c0_11] : memref<128x128xf32, #tpu.memory_space<vmem>>, vector<32x128xf32>
    %cst_12 = arith.constant dense<0.000000e+00> : vector<16x32xf32>
    %10 = tpu.matmul %3, %9, %cst_12 {dimension_numbers = #tpu.dot_dimension_numbers<[1], [1], [0], [0], [0, 0, 1, 0], [], []>} : vector<16x128xf32>, vector<32x128xf32>, vector<16x32xf32> -> vector<16x32xf32>
    %cst_13 = arith.constant dense<0.000000e+00> : vector<16x16xf32>
    %11 = tpu.matmul %6, %8, %cst_13 {dimension_numbers = #tpu.dot_dimension_numbers<[1], [1], [0], [0], [0, 0, 1, 0], [], []>} : vector<16x32xf32>, vector<16x32xf32>, vector<16x16xf32> -> vector<16x16xf32>
    %cst_14 = arith.constant dense<0xFF800000> : vector<16xf32>
    %12 = vector.multi_reduction <maximumf>, %11, %cst_14 [1] : vector<16x16xf32> to vector<16xf32>
    %13 = vector.shape_cast %12 : vector<16xf32> to vector<16x1xf32>
    %14 = vector.broadcast %13 : vector<16x1xf32> to vector<16x16xf32>
    %15 = arith.subf %11, %14 : vector<16x16xf32>
    %16 = math.exp %15 : vector<16x16xf32>
    %cst_15 = arith.constant dense<0.000000e+00> : vector<16xf32>
    %17 = vector.multi_reduction <add>, %16, %cst_15 [1] : vector<16x16xf32> to vector<16xf32>
    %18 = vector.shape_cast %17 : vector<16xf32> to vector<16x1xf32>
    %19 = tpu.reciprocal %18 : vector<16x1xf32> -> vector<16x1xf32>
    %20 = vector.broadcast %19 : vector<16x1xf32> to vector<16x16xf32>
    %21 = arith.mulf %16, %20 : vector<16x16xf32>
    %cst_16 = arith.constant dense<0.000000e+00> : vector<16x32xf32>
    %22 = tpu.matmul %21, %10, %cst_16 {dimension_numbers = #tpu.dot_dimension_numbers<[1], [0], [0], [1], [0, 0, 1, 1], [], []>} : vector<16x16xf32>, vector<16x32xf32>, vector<16x32xf32> -> vector<16x32xf32>
    %c0_17 = arith.constant 0 : index
    %c0_18 = arith.constant 0 : index
    %23 = vector.load %arg6[%c0_17, %c0_18] : memref<128x128xf32, #tpu.memory_space<vmem>>, vector<32x128xf32>
    %cst_19 = arith.constant dense<0.000000e+00> : vector<16x128xf32>
    %24 = tpu.matmul %22, %23, %cst_19 {dimension_numbers = #tpu.dot_dimension_numbers<[1], [0], [0], [1], [0, 0, 1, 1], [], []>} : vector<16x32xf32>, vector<32x128xf32>, vector<16x128xf32> -> vector<16x128xf32>
    %25 = arith.addf %4, %24 : vector<16x128xf32>
    %c32 = arith.constant 32 : index
    %c0_20 = arith.constant 0 : index
    %26 = vector.load %arg3[%c32, %c0_20] : memref<128x128xf32, #tpu.memory_space<vmem>>, vector<32x128xf32>
    %cst_21 = arith.constant dense<0.000000e+00> : vector<16x32xf32>
    %27 = tpu.matmul %2, %26, %cst_21 {dimension_numbers = #tpu.dot_dimension_numbers<[1], [1], [0], [0], [0, 0, 1, 0], [], []>} : vector<16x128xf32>, vector<32x128xf32>, vector<16x32xf32> -> vector<16x32xf32>
    %c32_22 = arith.constant 32 : index
    %c0_23 = arith.constant 0 : index
    %28 = vector.load %arg4[%c32_22, %c0_23] : memref<128x128xf32, #tpu.memory_space<vmem>>, vector<32x128xf32>
    %cst_24 = arith.constant dense<0.000000e+00> : vector<16x32xf32>
    %29 = tpu.matmul %3, %28, %cst_24 {dimension_numbers = #tpu.dot_dimension_numbers<[1], [1], [0], [0], [0, 0, 1, 0], [], []>} : vector<16x128xf32>, vector<32x128xf32>, vector<16x32xf32> -> vector<16x32xf32>
    %c32_25 = arith.constant 32 : index
    %c0_26 = arith.constant 0 : index
    %30 = vector.load %arg5[%c32_25, %c0_26] : memref<128x128xf32, #tpu.memory_space<vmem>>, vector<32x128xf32>
    %cst_27 = arith.constant dense<0.000000e+00> : vector<16x32xf32>
    %31 = tpu.matmul %3, %30, %cst_27 {dimension_numbers = #tpu.dot_dimension_numbers<[1], [1], [0], [0], [0, 0, 1, 0], [], []>} : vector<16x128xf32>, vector<32x128xf32>, vector<16x32xf32> -> vector<16x32xf32>
    %cst_28 = arith.constant dense<0.000000e+00> : vector<16x16xf32>
    %32 = tpu.matmul %27, %29, %cst_28 {dimension_numbers = #tpu.dot_dimension_numbers<[1], [1], [0], [0], [0, 0, 1, 0], [], []>} : vector<16x32xf32>, vector<16x32xf32>, vector<16x16xf32> -> vector<16x16xf32>
    %cst_29 = arith.constant dense<0xFF800000> : vector<16xf32>
    %33 = vector.multi_reduction <maximumf>, %32, %cst_29 [1] : vector<16x16xf32> to vector<16xf32>
    %34 = vector.shape_cast %33 : vector<16xf32> to vector<16x1xf32>
    %35 = vector.broadcast %34 : vector<16x1xf32> to vector<16x16xf32>
    %36 = arith.subf %32, %35 : vector<16x16xf32>
    %37 = math.exp %36 : vector<16x16xf32>
    %cst_30 = arith.constant dense<0.000000e+00> : vector<16xf32>
    %38 = vector.multi_reduction <add>, %37, %cst_30 [1] : vector<16x16xf32> to vector<16xf32>
    %39 = vector.shape_cast %38 : vector<16xf32> to vector<16x1xf32>
    %40 = tpu.reciprocal %39 : vector<16x1xf32> -> vector<16x1xf32>
    %41 = vector.broadcast %40 : vector<16x1xf32> to vector<16x16xf32>
    %42 = arith.mulf %37, %41 : vector<16x16xf32>
    %cst_31 = arith.constant dense<0.000000e+00> : vector<16x32xf32>
    %43 = tpu.matmul %42, %31, %cst_31 {dimension_numbers = #tpu.dot_dimension_numbers<[1], [0], [0], [1], [0, 0, 1, 1], [], []>} : vector<16x16xf32>, vector<16x32xf32>, vector<16x32xf32> -> vector<16x32xf32>
    %c32_32 = arith.constant 32 : index
    %c0_33 = arith.constant 0 : index
    %44 = vector.load %arg6[%c32_32, %c0_33] : memref<128x128xf32, #tpu.memory_space<vmem>>, vector<32x128xf32>
    %cst_34 = arith.constant dense<0.000000e+00> : vector<16x128xf32>
    %45 = tpu.matmul %43, %44, %cst_34 {dimension_numbers = #tpu.dot_dimension_numbers<[1], [0], [0], [1], [0, 0, 1, 1], [], []>} : vector<16x32xf32>, vector<32x128xf32>, vector<16x128xf32> -> vector<16x128xf32>
    %46 = arith.addf %25, %45 : vector<16x128xf32>
    %c64 = arith.constant 64 : index
    %c0_35 = arith.constant 0 : index
    %47 = vector.load %arg3[%c64, %c0_35] : memref<128x128xf32, #tpu.memory_space<vmem>>, vector<32x128xf32>
    %cst_36 = arith.constant dense<0.000000e+00> : vector<16x32xf32>
    %48 = tpu.matmul %2, %47, %cst_36 {dimension_numbers = #tpu.dot_dimension_numbers<[1], [1], [0], [0], [0, 0, 1, 0], [], []>} : vector<16x128xf32>, vector<32x128xf32>, vector<16x32xf32> -> vector<16x32xf32>
    %c64_37 = arith.constant 64 : index
    %c0_38 = arith.constant 0 : index
    %49 = vector.load %arg4[%c64_37, %c0_38] : memref<128x128xf32, #tpu.memory_space<vmem>>, vector<32x128xf32>
    %cst_39 = arith.constant dense<0.000000e+00> : vector<16x32xf32>
    %50 = tpu.matmul %3, %49, %cst_39 {dimension_numbers = #tpu.dot_dimension_numbers<[1], [1], [0], [0], [0, 0, 1, 0], [], []>} : vector<16x128xf32>, vector<32x128xf32>, vector<16x32xf32> -> vector<16x32xf32>
    %c64_40 = arith.constant 64 : index
    %c0_41 = arith.constant 0 : index
    %51 = vector.load %arg5[%c64_40, %c0_41] : memref<128x128xf32, #tpu.memory_space<vmem>>, vector<32x128xf32>
    %cst_42 = arith.constant dense<0.000000e+00> : vector<16x32xf32>
    %52 = tpu.matmul %3, %51, %cst_42 {dimension_numbers = #tpu.dot_dimension_numbers<[1], [1], [0], [0], [0, 0, 1, 0], [], []>} : vector<16x128xf32>, vector<32x128xf32>, vector<16x32xf32> -> vector<16x32xf32>
    %cst_43 = arith.constant dense<0.000000e+00> : vector<16x16xf32>
    %53 = tpu.matmul %48, %50, %cst_43 {dimension_numbers = #tpu.dot_dimension_numbers<[1], [1], [0], [0], [0, 0, 1, 0], [], []>} : vector<16x32xf32>, vector<16x32xf32>, vector<16x16xf32> -> vector<16x16xf32>
    %cst_44 = arith.constant dense<0xFF800000> : vector<16xf32>
    %54 = vector.multi_reduction <maximumf>, %53, %cst_44 [1] : vector<16x16xf32> to vector<16xf32>
    %55 = vector.shape_cast %54 : vector<16xf32> to vector<16x1xf32>
    %56 = vector.broadcast %55 : vector<16x1xf32> to vector<16x16xf32>
    %57 = arith.subf %53, %56 : vector<16x16xf32>
    %58 = math.exp %57 : vector<16x16xf32>
    %cst_45 = arith.constant dense<0.000000e+00> : vector<16xf32>
    %59 = vector.multi_reduction <add>, %58, %cst_45 [1] : vector<16x16xf32> to vector<16xf32>
    %60 = vector.shape_cast %59 : vector<16xf32> to vector<16x1xf32>
    %61 = tpu.reciprocal %60 : vector<16x1xf32> -> vector<16x1xf32>
    %62 = vector.broadcast %61 : vector<16x1xf32> to vector<16x16xf32>
    %63 = arith.mulf %58, %62 : vector<16x16xf32>
    %cst_46 = arith.constant dense<0.000000e+00> : vector<16x32xf32>
    %64 = tpu.matmul %63, %52, %cst_46 {dimension_numbers = #tpu.dot_dimension_numbers<[1], [0], [0], [1], [0, 0, 1, 1], [], []>} : vector<16x16xf32>, vector<16x32xf32>, vector<16x32xf32> -> vector<16x32xf32>
    %c64_47 = arith.constant 64 : index
    %c0_48 = arith.constant 0 : index
    %65 = vector.load %arg6[%c64_47, %c0_48] : memref<128x128xf32, #tpu.memory_space<vmem>>, vector<32x128xf32>
    %cst_49 = arith.constant dense<0.000000e+00> : vector<16x128xf32>
    %66 = tpu.matmul %64, %65, %cst_49 {dimension_numbers = #tpu.dot_dimension_numbers<[1], [0], [0], [1], [0, 0, 1, 1], [], []>} : vector<16x32xf32>, vector<32x128xf32>, vector<16x128xf32> -> vector<16x128xf32>
    %67 = arith.addf %46, %66 : vector<16x128xf32>
    %c96 = arith.constant 96 : index
    %c0_50 = arith.constant 0 : index
    %68 = vector.load %arg3[%c96, %c0_50] : memref<128x128xf32, #tpu.memory_space<vmem>>, vector<32x128xf32>
    %cst_51 = arith.constant dense<0.000000e+00> : vector<16x32xf32>
    %69 = tpu.matmul %2, %68, %cst_51 {dimension_numbers = #tpu.dot_dimension_numbers<[1], [1], [0], [0], [0, 0, 1, 0], [], []>} : vector<16x128xf32>, vector<32x128xf32>, vector<16x32xf32> -> vector<16x32xf32>
    %c96_52 = arith.constant 96 : index
    %c0_53 = arith.constant 0 : index
    %70 = vector.load %arg4[%c96_52, %c0_53] : memref<128x128xf32, #tpu.memory_space<vmem>>, vector<32x128xf32>
    %cst_54 = arith.constant dense<0.000000e+00> : vector<16x32xf32>
    %71 = tpu.matmul %3, %70, %cst_54 {dimension_numbers = #tpu.dot_dimension_numbers<[1], [1], [0], [0], [0, 0, 1, 0], [], []>} : vector<16x128xf32>, vector<32x128xf32>, vector<16x32xf32> -> vector<16x32xf32>
    %c96_55 = arith.constant 96 : index
    %c0_56 = arith.constant 0 : index
    %72 = vector.load %arg5[%c96_55, %c0_56] : memref<128x128xf32, #tpu.memory_space<vmem>>, vector<32x128xf32>
    %cst_57 = arith.constant dense<0.000000e+00> : vector<16x32xf32>
    %73 = tpu.matmul %3, %72, %cst_57 {dimension_numbers = #tpu.dot_dimension_numbers<[1], [1], [0], [0], [0, 0, 1, 0], [], []>} : vector<16x128xf32>, vector<32x128xf32>, vector<16x32xf32> -> vector<16x32xf32>
    %cst_58 = arith.constant dense<0.000000e+00> : vector<16x16xf32>
    %74 = tpu.matmul %69, %71, %cst_58 {dimension_numbers = #tpu.dot_dimension_numbers<[1], [1], [0], [0], [0, 0, 1, 0], [], []>} : vector<16x32xf32>, vector<16x32xf32>, vector<16x16xf32> -> vector<16x16xf32>
    %cst_59 = arith.constant dense<0xFF800000> : vector<16xf32>
    %75 = vector.multi_reduction <maximumf>, %74, %cst_59 [1] : vector<16x16xf32> to vector<16xf32>
    %76 = vector.shape_cast %75 : vector<16xf32> to vector<16x1xf32>
    %77 = vector.broadcast %76 : vector<16x1xf32> to vector<16x16xf32>
    %78 = arith.subf %74, %77 : vector<16x16xf32>
    %79 = math.exp %78 : vector<16x16xf32>
    %cst_60 = arith.constant dense<0.000000e+00> : vector<16xf32>
    %80 = vector.multi_reduction <add>, %79, %cst_60 [1] : vector<16x16xf32> to vector<16xf32>
    %81 = vector.shape_cast %80 : vector<16xf32> to vector<16x1xf32>
    %82 = tpu.reciprocal %81 : vector<16x1xf32> -> vector<16x1xf32>
    %83 = vector.broadcast %82 : vector<16x1xf32> to vector<16x16xf32>
    %84 = arith.mulf %79, %83 : vector<16x16xf32>
    %cst_61 = arith.constant dense<0.000000e+00> : vector<16x32xf32>
    %85 = tpu.matmul %84, %73, %cst_61 {dimension_numbers = #tpu.dot_dimension_numbers<[1], [0], [0], [1], [0, 0, 1, 1], [], []>} : vector<16x16xf32>, vector<16x32xf32>, vector<16x32xf32> -> vector<16x32xf32>
    %c96_62 = arith.constant 96 : index
    %c0_63 = arith.constant 0 : index
    %86 = vector.load %arg6[%c96_62, %c0_63] : memref<128x128xf32, #tpu.memory_space<vmem>>, vector<32x128xf32>
    %cst_64 = arith.constant dense<0.000000e+00> : vector<16x128xf32>
    %87 = tpu.matmul %85, %86, %cst_64 {dimension_numbers = #tpu.dot_dimension_numbers<[1], [0], [0], [1], [0, 0, 1, 1], [], []>} : vector<16x32xf32>, vector<32x128xf32>, vector<16x128xf32> -> vector<16x128xf32>
    %88 = arith.addf %67, %87 : vector<16x128xf32>
    %c0_65 = arith.constant 0 : index
    %c0_66 = arith.constant 0 : index
    %89 = vector.load %arg7[%c0_65, %c0_66] : memref<16x128xf32, #tpu.memory_space<vmem>>, vector<16x128xf32>
    tpu.vector_store %arg7[%c0_65, %c0_66], %88 {strides = array<i32>} : memref<16x128xf32, #tpu.memory_space<vmem>>, vector<16x128xf32>,
    return
  }
  func.func @transform_0(%arg0: i32) -> (i32, i32) {
    %c0_i32 = arith.constant 0 : i32
    %c0_i32_0 = arith.constant 0 : i32
    return %arg0, %c0_i32 : i32, i32
  }
  func.func @transform_1(%arg0: i32) -> (i32, i32) {
    %c0_i32 = arith.constant 0 : i32
    %c0_i32_0 = arith.constant 0 : i32
    %c0_i32_1 = arith.constant 0 : i32
    return %c0_i32, %c0_i32_0 : i32, i32
  }
  func.func @transform_2(%arg0: i32) -> (i32, i32) {
    %c0_i32 = arith.constant 0 : i32
    %c0_i32_0 = arith.constant 0 : i32
    %c0_i32_1 = arith.constant 0 : i32
    return %c0_i32, %c0_i32_0 : i32, i32
  }
  func.func @transform_3(%arg0: i32) -> (i32, i32) {
    %c0_i32 = arith.constant 0 : i32
    %c0_i32_0 = arith.constant 0 : i32
    %c0_i32_1 = arith.constant 0 : i32
    return %c0_i32, %c0_i32_0 : i32, i32
  }
  func.func @transform_4(%arg0: i32) -> (i32, i32) {
    %c0_i32 = arith.constant 0 : i32
    %c0_i32_0 = arith.constant 0 : i32
    %c0_i32_1 = arith.constant 0 : i32
    return %c0_i32, %c0_i32_0 : i32, i32
  }
  func.func @transform_5(%arg0: i32) -> (i32, i32) {
    %c0_i32 = arith.constant 0 : i32
    %c0_i32_0 = arith.constant 0 : i32
    %c0_i32_1 = arith.constant 0 : i32
    return %c0_i32, %c0_i32_0 : i32, i32
  }
  func.func @transform_6(%arg0: i32) -> (i32, i32) {
    %c0_i32 = arith.constant 0 : i32
    %c0_i32_0 = arith.constant 0 : i32
    return %arg0, %c0_i32 : i32, i32
  }
}

</mosaic_0001>

<bundles_post_ra>
// kernel: tpu_custom_call.1
= control target key start
LH: loop header
LB: loop body
LE: loop exit
PB: predicated region body
PF: predicated region fallthrough
CT: control target
= control target key end

     0   :  { %11 = vsyncpa [#allocation3], 0  ;;  %s2969_s0 = inlined_call_operand.hbm [shape: f32[16,128], index: 0, kind: input, shape index: {}]   ;;  %s2970_s1 = inlined_call_operand.hbm [shape: f32[16,128], index: 1, kind: input, shape index: {}]   ;;  %s2971_s2 = inlined_call_operand.hbm [shape: f32[128,128], index: 2, kind: input, shape index: {}]   ;;  %s2972_s3 = inlined_call_operand.hbm [shape: f32[128,128], index: 3, kind: input, shape index: {}]   ;;  %s2973_s4 = inlined_call_operand.hbm [shape: f32[128,128], index: 4, kind: input, shape index: {}]   ;;  %s2974_s5 = inlined_call_operand.hbm [shape: f32[128,128], index: 5, kind: input, shape index: {}]   ;;  %s2975_s6 = inlined_call_operand.hbm [shape: f32[16,128], index: 6, kind: output, shape index: {}]  }
   0x1   :  { %12 = vsyncpa [#allocation6], 0 }
   0x2   :  { %13 = vsyncpa [#allocation9], 0 }
   0x3   :  { %14 = vsyncpa [#allocation12], 0 }
   0x4   :  { %15 = vsyncpa [#allocation4], 0  ;;  %s2771_s21 = smov [#allocation5]   ;;  %s2772_s23 = smov [#allocation8]  }
   0x5   :  { %s33_s22 = sshll.u32 %s2771_s21, 4  ;;  %s57_s24 = sshll.u32 %s2772_s23, 4  ;;  %s34_s22 = int_to_ptr.vmem [resolvable:$true] %s33_s22  ;;  %s58_s24 = int_to_ptr.vmem [resolvable:$true] %s57_s24 }
   0x6   :  { %s2629_s25 = scalar_lea.vmem %s34_s22, 256  ;;  %p2634_p1 = scmp.lt.s32.totalorder %s34_s22, %s34_s22 }
   0x7   :  { %p2630_p0 = scmp.ne.s32.totalorder %s34_s22, %s2629_s25  ;;  %p2635_p2 = scmp.lt.s32.totalorder %s2629_s25, %s2629_s25 }
   0x9   :  { %p2636_p3 = por %p2635_p2, %p2634_p1 }
   0xb   :  { %p2637_p4 = pnand %p2636_p3, %p2630_p0 }
   0xd   :  { %2640 = shalt.err (!%p2637_p4)
}
   0xe   :  { %s2773_s26 = smov 128   ;;  %s2774_s27 = smov 8  }
   0xf   :  { %39 = dma.hbm_to_vmem [thread:$0]  %s2970_s1, 256, %s34_s22, [#allocation6], %s2773_s26, %s2773_s26, %s2774_s27  }
  0x10   :  { %s2649_s30 = scalar_lea.vmem %s58_s24, 2048  ;;  %p2654_p6 = scmp.lt.s32.totalorder %s58_s24, %s58_s24 }
  0x11   :  { %p2650_p5 = scmp.ne.s32.totalorder %s58_s24, %s2649_s30  ;;  %p2655_p7 = scmp.lt.s32.totalorder %s2649_s30, %s2649_s30 }
  0x13   :  { %p2656_p8 = por %p2655_p7, %p2654_p6 }
  0x15   :  { %p2657_p9 = pnand %p2656_p8, %p2650_p5 }
  0x17   :  { %2660 = shalt.err (!%p2657_p9)
}
  0x18   :  { %63 = dma.hbm_to_vmem [thread:$0]  %s2972_s3, 2048, %s58_s24, [#allocation9], %s2773_s26, %s2773_s26, %s2774_s27  }
  0x19   :  { %s2775_s9 = smov [#allocation2]   ;;  %s2776_s11 = smov [#allocation7]  }
  0x1a   :  { %s21_s10 = sshll.u32 %s2775_s9, 4  ;;  %s45_s12 = sshll.u32 %s2776_s11, 4  ;;  %s22_s10 = int_to_ptr.vmem [resolvable:$true] %s21_s10  ;;  %s46_s12 = int_to_ptr.vmem [resolvable:$true] %s45_s12 }
  0x1b   :  { %s2669_s1 = scalar_lea.vmem %s22_s10, 256  ;;  %p2674_p11 = scmp.lt.s32.totalorder %s22_s10, %s22_s10 }
  0x1c   :  { %p2670_p10 = scmp.ne.s32.totalorder %s22_s10, %s2669_s1  ;;  %p2675_p12 = scmp.lt.s32.totalorder %s2669_s1, %s2669_s1 }
  0x1e   :  { %p2676_p13 = por %p2675_p12, %p2674_p11 }
  0x20   :  { %p2677_p0 = pnand %p2676_p13, %p2670_p10 }
  0x22   :  { %2680 = shalt.err (!%p2677_p0)
}
  0x23   :  { %27 = dma.hbm_to_vmem [thread:$0]  %s2969_s0, 256, %s22_s10, [#allocation3], %s2773_s26, %s2773_s26, %s2774_s27  }
  0x24   :  { %s2689_s3 = scalar_lea.vmem %s46_s12, 2048  ;;  %p2694_p2 = scmp.lt.s32.totalorder %s46_s12, %s46_s12 }
  0x25   :  { %p2690_p1 = scmp.ne.s32.totalorder %s46_s12, %s2689_s3  ;;  %p2695_p3 = scmp.lt.s32.totalorder %s2689_s3, %s2689_s3 }
  0x27   :  { %p2696_p4 = por %p2695_p3, %p2694_p2 }
  0x29   :  { %p2697_p5 = pnand %p2696_p4, %p2690_p1 }
  0x2b   :  { %2700 = shalt.err (!%p2697_p5)
}
  0x2c   :  { %51 = dma.hbm_to_vmem [thread:$0]  %s2971_s2, 2048, %s46_s12, [#allocation6], %s2773_s26, %s2773_s26, %s2774_s27  }
  0x2d   :  { %s2777_s17 = smov [#allocation10]   ;;  %s2778_s19 = smov [#allocation11]  }
  0x2e   :  { %s69_s18 = sshll.u32 %s2777_s17, 4  ;;  %s81_s20 = sshll.u32 %s2778_s19, 4  ;;  %s70_s18 = int_to_ptr.vmem [resolvable:$true] %s69_s18  ;;  %s82_s20 = int_to_ptr.vmem [resolvable:$true] %s81_s20 }
  0x2f   :  { %s2709_s0 = scalar_lea.vmem %s70_s18, 2048  ;;  %p2714_p7 = scmp.lt.s32.totalorder %s70_s18, %s70_s18 }
  0x30   :  { %p2710_p6 = scmp.ne.s32.totalorder %s70_s18, %s2709_s0  ;;  %p2715_p8 = scmp.lt.s32.totalorder %s2709_s0, %s2709_s0 }
  0x32   :  { %p2716_p9 = por %p2715_p8, %p2714_p7 }
  0x34   :  { %p2717_p10 = pnand %p2716_p9, %p2710_p6 }
  0x36   :  { %2720 = shalt.err (!%p2717_p10)
}
  0x37   :  { %75 = dma.hbm_to_vmem [thread:$0]  %s2973_s4, 2048, %s70_s18, [#allocation9], %s2773_s26, %s2773_s26, %s2774_s27  }
  0x38   :  { %s2729_s2 = scalar_lea.vmem %s82_s20, 2048  ;;  %p2734_p12 = scmp.lt.s32.totalorder %s82_s20, %s82_s20 }
  0x39   :  { %p2730_p11 = scmp.ne.s32.totalorder %s82_s20, %s2729_s2  ;;  %p2735_p13 = scmp.lt.s32.totalorder %s2729_s2, %s2729_s2 }
  0x3b   :  { %p2736_p0 = por %p2735_p13, %p2734_p12 }
  0x3d   :  { %p2737_p1 = pnand %p2736_p0, %p2730_p11 }
  0x3f   :  { %2740 = shalt.err (!%p2737_p1)
}
  0x40   :  { %87 = dma.hbm_to_vmem [thread:$0]  %s2974_s5, 2048, %s82_s20, [#allocation12], %s2773_s26, %s2773_s26, %s2774_s27  }
  0x41   :  { %2761 = dma.done.wait [#allocation3], 256  }
  0x42   :  { %2762 = vsyncadd [#allocation3], 4294967040 }
  0x43   :  { %2763 = dma.done.wait [#allocation6], 2304  }
  0x44   :  { %2764 = vsyncadd [#allocation6], 4294964992 }
  0x45   :  { %2765 = dma.done.wait [#allocation9], 4096  }
  0x46   :  { %2766 = vsyncadd [#allocation9], 4294963200 }
  0x47   :  { %2767 = dma.done.wait [#allocation12], 2048  }
  0x48   :  { %2768 = vsyncadd [#allocation12], 4294965248  ;;  %v194_v0 = vld [vmem:[#allocation8 + $0x18] sm:$0xff]  ;;  %v193_v2 = vld [vmem:[#allocation8 + $0x10] sm:$0xff]  ;;  %vm349_vm0 = vcmask 261120   ;;  %vm437_vm1 = vcmask 130048  }
  0x49   :  { %v115_v1 = vld [vmem:[#allocation7 + $0x18] sm:$0xff]  ;;  %2359 = vmatprep.subr.mxu1 %v194_v0  ;;  %v114_v3 = vld [vmem:[#allocation7 + $0x10] sm:$0xff]  ;;  %v106_v5 = vld [vmem:[#allocation2] sm:$0xff]  ;;  %s2779_s4 = smov [#allocation13]  }
  0x4a   :  { %2348 = vmatprep.subr.mxu0 %v115_v1  ;;  %2360 = vmatpush3.xpose.msra.mxu1 %v194_v0  ;;  %v2851_v4 = vld [vmem:[#allocation5] sm:$0xff]  ;;  %v192_v6 = vld [vmem:[#allocation8 + $0x8] sm:$0xff]  ;;  %v2854_v8 = vmul.f32 0.17677669, %v106_v5  ;;  %v191_v9 = vld [vmem:[#allocation8] sm:$0xff]  ;;  %s2173_s5 = sshll.u32 %s2779_s4, 4  ;;  %s2174_s5 = int_to_ptr.vmem [resolvable:$true] %s2173_s5 }
  0x4b   :  { %2349 = vmatpush3.xpose.msra.mxu0 %v115_v1  ;;  %2361 = vmatprep.subr.mxu1 %v193_v2  ;;  %v113_v7 = vld [vmem:[#allocation7 + $0x8] sm:$0xff]  ;;  %v112_v10 = vld [vmem:[#allocation7] sm:$0xff]  ;;  %v2859_v13 = vld [vmem:[#allocation5 + $0x8] sm:$0xff]  ;;  %s2741_s25 = scalar_lea.vmem %s2174_s5, 256  ;;  %p2746_p3 = scmp.lt.s32.totalorder %s2174_s5, %s2174_s5 }
  0x4c   :  { %2350 = vmatprep.subr.mxu0 %v114_v3  ;;  %2367 = vmatprep.mubr.f32.mxu1 %v2851_v4  ;;  %v107_v11 = vld [vmem:[#allocation2 + $0x8] sm:$0xff]  ;;  %v273_v18 = vld [vmem:[#allocation10 + $0x18] sm:$0xff]  ;;  %v272_v19 = vld [vmem:[#allocation10 + $0x10] sm:$0xff]  ;;  %p2742_p2 = scmp.ne.s32.totalorder %s2174_s5, %s2741_s25  ;;  %p2747_p4 = scmp.lt.s32.totalorder %s2741_s25, %s2741_s25 }
  0x4d   :  { %2356 = vmatprep.mubr.f32.mxu0 %v2854_v8  ;;  %v2857_v12 = vmul.f32 0.17677669, %v107_v11  ;;  %v271_v20 = vld [vmem:[#allocation10 + $0x8] sm:$0xff]  ;;  %v270_v21 = vld [vmem:[#allocation10] sm:$0xff]  ;;  %v627_v36 = vld [vmem:[#allocation8 + $0x38] sm:$0xff] }
  0x4e   :  { %2362 = vmatpush3.xpose.msra.mxu1 %v193_v2  ;;  %v626_v38 = vld [vmem:[#allocation8 + $0x30] sm:$0xff]  ;;  %v625_v40 = vld [vmem:[#allocation8 + $0x28] sm:$0xff]  ;;  %v548_v41 = vld [vmem:[#allocation7 + $0x38] sm:$0xff]  ;;  %p2748_p5 = por %p2747_p4, %p2746_p3 }
  0x4f   :  { %2351 = vmatpush3.xpose.msra.mxu0 %v114_v3  ;;  %2363 = vmatprep.subr.mxu1 %v192_v6  ;;  %v624_v42 = vld [vmem:[#allocation8 + $0x20] sm:$0xff]  ;;  %v547_v49 = vld [vmem:[#allocation7 + $0x30] sm:$0xff]  ;;  %v546_v50 = vld [vmem:[#allocation7 + $0x28] sm:$0xff] }
  0x50   :  { %2352 = vmatprep.subr.mxu0 %v113_v7  ;;  %v545_v51 = vld [vmem:[#allocation7 + $0x20] sm:$0xff]  ;;  %v706_v58 = vld [vmem:[#allocation10 + $0x38] sm:$0xff]  ;;  %v705_v59 = vld [vmem:[#allocation10 + $0x30] sm:$0xff]  ;;  %p2749_p6 = pnand %p2748_p5, %p2742_p2 }
  0x51   :  { %v704_v60 = vld [vmem:[#allocation10 + $0x28] sm:$0xff]  ;;  %v703_v61 = vld [vmem:[#allocation10 + $0x20] sm:$0xff] }
  0x52   :  { %2364 = vmatpush3.xpose.msra.mxu1 %v192_v6 }
  0x53   :  { %2353 = vmatpush3.xpose.msra.mxu0 %v113_v7  ;;  %2365 = vmatprep.subr.mxu1 %v191_v9 }
  0x54   :  { %2354 = vmatprep.subr.mxu0 %v112_v10 }
  0x56   :  { %2366 = vmatpush3.xpose.msra.mxu1 %v191_v9 }
  0x57   :  { %2355 = vmatpush3.xpose.msra.mxu0 %v112_v10 }
  0x58   :  { %2370 = vmatprep.subr.mxu0 %v273_v18 }
  0x59   :  { %2368 = vmatmul.mubr.f32.vlgmr.msra.gmra.mxu1 %v2859_v13 }
  0x5a   :  { %2357 = vmatmul.mubr.f32.vlgmr.msra.gmra.mxu0 %v2857_v12 }
  0x5b   :  { %2378 = vmatprep.mubr.f32.mxu0 %v2851_v4  ;;  %2371 = vmatpush3.xpose.msra.mxu0 %v273_v18  ;;  %v544_v18 = vld [vmem:[#allocation11 + $0x18] sm:$0xff] }
  0x5c   :  { %2372 = vmatprep.subr.mxu0 %v272_v19 }
  0x5f   :  { %2373 = vmatpush3.xpose.msra.mxu0 %v272_v19  ;;  %v975_v19 = vld [vmem:[#allocation11 + $0x38] sm:$0xff] }
  0x60   :  { %2374 = vmatprep.subr.mxu0 %v271_v20 }
  0x63   :  { %2375 = vmatpush3.xpose.msra.mxu0 %v271_v20  ;;  %v974_v20 = vld [vmem:[#allocation11 + $0x30] sm:$0xff] }
  0x64   :  { %2376 = vmatprep.subr.mxu0 %v270_v21 }
  0x67   :  { %2377 = vmatpush3.xpose.msra.mxu0 %v270_v21  ;;  %v973_v21 = vld [vmem:[#allocation11 + $0x28] sm:$0xff] }
  0x68   :  { %2406 = vmatprep.subr.mxu0 %v627_v36 }
  0x6a   :  { %2379 = vmatmul.mubr.f32.vlgmr.msra.gmra.mxu0 %v2859_v13 }
  0x6b   :  { %2414 = vmatprep.mubr.f32.mxu0 %v2851_v4  ;;  %2407 = vmatpush3.xpose.msra.mxu0 %v627_v36  ;;  %v1217_v36 = vld [vmem:[#allocation8 + $0x40] sm:$0xff] }
  0x6c   :  { %2408 = vmatprep.subr.mxu0 %v626_v38 }
  0x6f   :  { %2409 = vmatpush3.xpose.msra.mxu0 %v626_v38 }
  0x70   :  { %2410 = vmatprep.subr.mxu0 %v625_v40 }
  0x73   :  { %2411 = vmatpush3.xpose.msra.mxu0 %v625_v40  ;;  %v1139_v40 = vld [vmem:[#allocation7 + $0x48] sm:$0xff] }
  0x74   :  { %2412 = vmatprep.subr.mxu0 %v624_v42 }
  0x77   :  { %2413 = vmatpush3.xpose.msra.mxu0 %v624_v42 }
  0x7a   :  { %2415 = vmatmul.mubr.f32.vlgmr.msra.gmra.mxu0 %v2859_v13 }
 0x119   :  { %v2369_v14 = vpop.f32.mrf.mxu1 }
 0x11a   :  { %v2358_v15 = vpop.f32.mrf.mxu0  ;;  %2381 = vmatprep.subr.msk.mxu1 %vm349_vm0, %v2369_v14 }
 0x11b   :  { %v261_v16 = vpop.f32.mrf.mxu1  ;;  %2382 = vmatpush3.xpose.msk.msra.mxu1 %vm349_vm0, %v2369_v14 }
 0x11c   :  { %v182_v17 = vpop.f32.mrf.mxu0  ;;  %2383 = vmatprep.subr.msk.mxu1 %vm349_vm0, %v261_v16 }
 0x11d   :  { %2385 = vmatprep.mubr.msk.f32.mxu1 %vm349_vm0, %v182_v17 }
 0x11f   :  { %2384 = vmatpush3.xpose.msk.msra.mxu1 %vm349_vm0, %v261_v16 }
 0x122   :  { %2386 = vmatmul.mubr.msk.f32.vlgmr.msra.gmra.mxu1 %vm349_vm0, %v2358_v15 }
 0x12a   :  { %v2380_v37 = vpop.f32.mrf.mxu0 }
 0x12b   :  { %2388 = vmatprep.subr.mxu1 %v2380_v37 }
 0x12c   :  { %v340_v39 = vpop.f32.mrf.mxu0  ;;  %2389 = vmatpush3.msra.mxu1 %v2380_v37 }
 0x12d   :  { %2390 = vmatprep.subr.mxu1 %v340_v39 }
 0x12e   :  { %2391 = vmatpush3.msra.mxu1 %v340_v39  ;;  %v1140_v39 = vld [vmem:[#allocation7 + $0x50] sm:$0xff] }
 0x12f   :  { %2395 = vmatprep.subr.mxu1 %v548_v41 }
 0x13a   :  { %v2416_v52 = vpop.f32.mrf.mxu0 }
 0x13b   :  { %2428 = vmatprep.subr.msk.mxu0 %vm349_vm0, %v2416_v52 }
 0x13c   :  { %2429 = vmatpush3.xpose.msk.msra.mxu0 %vm349_vm0, %v2416_v52  ;;  %v694_v53 = vpop.f32.mrf.mxu0  ;;  %v1297_v52 = vld [vmem:[#allocation10 + $0x48] sm:$0xff] }
 0x13d   :  { %2430 = vmatprep.subr.msk.mxu0 %vm349_vm0, %v694_v53 }
 0x140   :  { %2431 = vmatpush3.xpose.msk.msra.mxu0 %vm349_vm0, %v694_v53  ;;  %v1296_v53 = vld [vmem:[#allocation10 + $0x40] sm:$0xff] }
 0x141   :  { %2442 = vmatprep.subr.mxu0 %v975_v19 }
 0x1e2   :  { %v2387_v22 = vpop.f32.mrf.mxu1 }
 0x1e3   :  { %v441_v25 = vsel %vm437_vm1, %v2387_v22, -inf }
 0x1e4   :  { %v428_v23 = vpop.f32.mrf.mxu1 }
 0x1e5   :  { %v438_v24 = vsel %vm437_vm1, %v428_v23, -inf }
 0x1e6   :  { %439 = vmax.xlane.f32.xlu0 %v438_v24 }
 0x1ea   :  { %442 = vmax.xlane.f32.xlu0 %v441_v25 }
 0x26f   :  { %v440_v26 = vpop.xlane.xlu0 %439 }
 0x270   :  { %v444_v27 = vsub.f32 %v428_v23, %v440_v26 }
 0x272   :  { %v446_v28 = vmul.f32 1.442695, %v444_v27 }
 0x273   :  { %v443_v29 = vpop.xlane.xlu0 %442 }
 0x274   :  { %2589 = vpow2.f32 %v446_v28  ;;  %v445_v30 = vsub.f32 %v2387_v22, %v443_v29  ;;  %v543_v28 = vld [vmem:[#allocation11 + $0x10] sm:$0xff]  ;;  %v542_v29 = vld [vmem:[#allocation11 + $0x8] sm:$0xff] }
 0x276   :  { %v448_v31 = vmul.f32 1.442695, %v445_v30  ;;  %v541_v30 = vld [vmem:[#allocation11] sm:$0xff] }
 0x278   :  { %2591 = vpow2.f32 %v448_v31  ;;  %v1220_v31 = vld [vmem:[#allocation8 + $0x58] sm:$0xff] }
 0x281   :  { %v2590_v32 = vpop.eup %2589 }
 0x282   :  { %v450_v33 = vsel %vm437_vm1, %v2590_v32, 0.0 }
 0x283   :  { %451 = vadd.xlane.f32.xlu1 %v450_v33  ;;  %v972_v33 = vld [vmem:[#allocation11 + $0x20] sm:$0xff] }
 0x285   :  { %v2592_v34 = vpop.eup %2591 }
 0x286   :  { %v453_v35 = vsel %vm437_vm1, %v2592_v34, 0.0 }
 0x287   :  { %454 = vadd.xlane.f32.xlu1 %v453_v35  ;;  %v1141_v35 = vld [vmem:[#allocation7 + $0x58] sm:$0xff] }
 0x30c   :  { %v452_v43 = vpop.xlane.xlu1 %451 }
 0x30d   :  { %2593 = vrcp.f32 %v452_v43 }
 0x310   :  { %v455_v44 = vpop.xlane.xlu1 %454 }
 0x311   :  { %2595 = vrcp.f32 %v455_v44 }
 0x31a   :  { %v2594_v45 = vpop.eup %2593 }
 0x31b   :  { %v458_v46 = vmul.f32 %v2594_v45, %v2590_v32  ;;  %v1219_v32 = vld [vmem:[#allocation8 + $0x50] sm:$0xff] }
 0x31d   :  { %2392 = vmatprep.mubr.msk.f32.mxu1 %vm437_vm1, %v458_v46 }
 0x31e   :  { %v2596_v47 = vpop.eup %2595 }
 0x31f   :  { %v459_v48 = vmul.f32 %v2596_v47, %v2592_v34  ;;  %v1218_v34 = vld [vmem:[#allocation8 + $0x48] sm:$0xff] }
 0x321   :  { %2393 = vmatmul.mubr.msk.f32.vlgmr.msra.gmra.mxu1 %vm437_vm1, %v459_v48 }
 0x322   :  { %2396 = vmatpush3.xpose.msra.mxu1 %v548_v41  ;;  %2403 = vmatprep.mubr.f32.mxu1 %v2854_v8  ;;  %v1138_v41 = vld [vmem:[#allocation7 + $0x40] sm:$0xff] }
 0x323   :  { %2397 = vmatprep.subr.mxu1 %v547_v49 }
 0x326   :  { %2398 = vmatpush3.xpose.msra.mxu1 %v547_v49 }
 0x327   :  { %2399 = vmatprep.subr.mxu1 %v546_v50 }
 0x32a   :  { %2400 = vmatpush3.xpose.msra.mxu1 %v546_v50  ;;  %v1299_v50 = vld [vmem:[#allocation10 + $0x58] sm:$0xff] }
 0x32b   :  { %2401 = vmatprep.subr.mxu1 %v545_v51 }
 0x32e   :  { %2402 = vmatpush3.xpose.msra.mxu1 %v545_v51  ;;  %v1298_v51 = vld [vmem:[#allocation10 + $0x50] sm:$0xff] }
 0x32f   :  { %2417 = vmatprep.subr.mxu1 %v706_v58 }
 0x331   :  { %2404 = vmatmul.mubr.f32.vlgmr.msra.gmra.mxu1 %v2857_v12 }
 0x332   :  { %2425 = vmatprep.mubr.f32.mxu1 %v2851_v4  ;;  %2418 = vmatpush3.xpose.msra.mxu1 %v706_v58 }
 0x333   :  { %2419 = vmatprep.subr.mxu1 %v705_v59 }
 0x336   :  { %2420 = vmatpush3.xpose.msra.mxu1 %v705_v59 }
 0x337   :  { %2421 = vmatprep.subr.mxu1 %v704_v60 }
 0x33a   :  { %2422 = vmatpush3.xpose.msra.mxu1 %v704_v60 }
 0x33b   :  { %2423 = vmatprep.subr.mxu1 %v703_v61 }
 0x33e   :  { %2424 = vmatpush3.xpose.msra.mxu1 %v703_v61 }
 0x341   :  { %2426 = vmatmul.mubr.f32.vlgmr.msra.gmra.mxu1 %v2859_v13 }
 0x3e1   :  { %v2886_v54 = vpop.f32.mrf.mxu1 }
 0x3e3   :  { %v2888_v55 = vpop.f32.mrf.mxu1 }
 0x3f1   :  { %v2405_v56 = vpop.f32.mrf.mxu1 }
 0x3f3   :  { %v615_v57 = vpop.f32.mrf.mxu1 }
 0x3f4   :  { %2432 = vmatprep.mubr.msk.f32.mxu0 %vm349_vm0, %v615_v57 }
 0x3f5   :  { %2433 = vmatmul.mubr.msk.f32.vlgmr.msra.gmra.mxu0 %vm349_vm0, %v2405_v56 }
 0x3f6   :  { %2443 = vmatpush3.msra.mxu0 %v975_v19  ;;  %v1734_v19 = vld [vmem:[#allocation8 + $0x78] sm:$0xff] }
 0x3f7   :  { %2444 = vmatprep.subr.mxu0 %v974_v20 }
 0x3f8   :  { %2445 = vmatpush3.msra.mxu0 %v974_v20  ;;  %v1655_v20 = vld [vmem:[#allocation7 + $0x78] sm:$0xff] }
 0x3f9   :  { %2446 = vmatprep.subr.mxu0 %v973_v21 }
 0x3fa   :  { %2447 = vmatpush3.msra.mxu0 %v973_v21  ;;  %v1654_v21 = vld [vmem:[#allocation7 + $0x70] sm:$0xff] }
 0x3fb   :  { %2448 = vmatprep.subr.mxu0 %v972_v33 }
 0x3fc   :  { %2449 = vmatpush3.msra.mxu0 %v972_v33 }
 0x3fd   :  { %2464 = vmatprep.subr.mxu0 %v1141_v35 }
 0x401   :  { %v2427_v16 = vpop.f32.mrf.mxu1 }
 0x402   :  { %2435 = vmatprep.subr.mxu1 %v2427_v16 }
 0x403   :  { %v773_v17 = vpop.f32.mrf.mxu1  ;;  %2436 = vmatpush3.msra.mxu1 %v2427_v16  ;;  %v1567_v16 = vld [vmem:[#allocation11 + $0x50] sm:$0xff] }
 0x404   :  { %2437 = vmatprep.subr.mxu1 %v773_v17 }
 0x405   :  { %2438 = vmatpush3.msra.mxu1 %v773_v17  ;;  %v1566_v17 = vld [vmem:[#allocation11 + $0x48] sm:$0xff] }
 0x406   :  { %2453 = vmatprep.subr.mxu1 %v544_v18 }
 0x4b5   :  { %v2434_v62 = vpop.f32.mrf.mxu0 }
 0x4b6   :  { %v872_v63 = vsel %vm437_vm1, %v2434_v62, -inf }
 0x4b7   :  { %873 = vmax.xlane.f32.xlu1 %v872_v63  ;;  %v860_v0 = vpop.f32.mrf.mxu0 }
 0x4b8   :  { %v869_v1 = vsel %vm437_vm1, %v860_v0, -inf }
 0x4b9   :  { %870 = vmax.xlane.f32.xlu0 %v869_v1 }
 0x540   :  { %v874_v2 = vpop.xlane.xlu1 %873 }
 0x541   :  { %v876_v3 = vsub.f32 %v2434_v62, %v874_v2 }
 0x542   :  { %v871_v5 = vpop.xlane.xlu0 %870 }
 0x543   :  { %v879_v6 = vmul.f32 1.442695, %v876_v3  ;;  %v875_v7 = vsub.f32 %v860_v0, %v871_v5 }
 0x545   :  { %2597 = vpow2.f32 %v879_v6  ;;  %v877_v9 = vmul.f32 1.442695, %v875_v7  ;;  %v1568_v6 = vld [vmem:[#allocation11 + $0x58] sm:$0xff] }
 0x547   :  { %2599 = vpow2.f32 %v877_v9 }
 0x552   :  { %v2598_v10 = vpop.eup %2597 }
 0x553   :  { %v884_v11 = vsel %vm437_vm1, %v2598_v10, 0.0 }
 0x554   :  { %v2600_v14 = vpop.eup %2599  ;;  %885 = vadd.xlane.f32.xlu1 %v884_v11 }
 0x555   :  { %v881_v15 = vsel %vm437_vm1, %v2600_v14, 0.0 }
 0x556   :  { %882 = vadd.xlane.f32.xlu0 %v881_v15 }
 0x5dd   :  { %v886_v22 = vpop.xlane.xlu1 %885 }
 0x5de   :  { %2601 = vrcp.f32 %v886_v22  ;;  %v1653_v22 = vld [vmem:[#allocation7 + $0x68] sm:$0xff] }
 0x5df   :  { %v883_v23 = vpop.xlane.xlu0 %882 }
 0x5e0   :  { %2603 = vrcp.f32 %v883_v23  ;;  %v1652_v23 = vld [vmem:[#allocation7 + $0x60] sm:$0xff] }
 0x5eb   :  { %v2602_v24 = vpop.eup %2601 }
 0x5ec   :  { %v890_v27 = vmul.f32 %v2602_v24, %v2598_v10 }
 0x5ed   :  { %v2604_v25 = vpop.eup %2603 }
 0x5ee   :  { %v889_v26 = vmul.f32 %v2604_v25, %v2600_v14 }
 0x5f0   :  { %2439 = vmatprep.mubr.msk.f32.mxu1 %vm437_vm1, %v889_v26  ;;  %v1733_v26 = vld [vmem:[#allocation8 + $0x70] sm:$0xff] }
 0x5f1   :  { %2440 = vmatmul.mubr.msk.f32.vlgmr.msra.gmra.mxu1 %vm437_vm1, %v890_v27  ;;  %v1732_v27 = vld [vmem:[#allocation8 + $0x68] sm:$0xff] }
 0x5f2   :  { %2454 = vmatpush3.msra.mxu1 %v544_v18  ;;  %2461 = vmatprep.mubr.msk.f32.mxu1 %vm349_vm0, %v2888_v55  ;;  %v1565_v18 = vld [vmem:[#allocation11 + $0x40] sm:$0xff] }
 0x5f3   :  { %2455 = vmatprep.subr.mxu1 %v543_v28 }
 0x5f4   :  { %2456 = vmatpush3.msra.mxu1 %v543_v28  ;;  %v1731_v28 = vld [vmem:[#allocation8 + $0x60] sm:$0xff] }
 0x5f5   :  { %2457 = vmatprep.subr.mxu1 %v542_v29 }
 0x5f6   :  { %2458 = vmatpush3.msra.mxu1 %v542_v29 }
 0x5f7   :  { %2459 = vmatprep.subr.mxu1 %v541_v30 }
 0x5f8   :  { %2460 = vmatpush3.msra.mxu1 %v541_v30 }
 0x5f9   :  { %2462 = vmatmul.mubr.msk.f32.vlgmr.msra.gmra.mxu1 %vm349_vm0, %v2886_v54  ;;  %2475 = vmatprep.subr.mxu1 %v1220_v31 }
 0x5fa   :  { %2476 = vmatpush3.xpose.msra.mxu1 %v1220_v31  ;;  %2483 = vmatprep.mubr.f32.mxu1 %v2851_v4 }
 0x5fb   :  { %2477 = vmatprep.subr.mxu1 %v1219_v32 }
 0x5fe   :  { %2478 = vmatpush3.xpose.msra.mxu1 %v1219_v32 }
 0x5ff   :  { %2479 = vmatprep.subr.mxu1 %v1218_v34 }
 0x602   :  { %2480 = vmatpush3.xpose.msra.mxu1 %v1218_v34 }
 0x603   :  { %2481 = vmatprep.subr.mxu1 %v1217_v36 }
 0x606   :  { %2482 = vmatpush3.xpose.msra.mxu1 %v1217_v36 }
 0x609   :  { %2484 = vmatmul.mubr.f32.vlgmr.msra.gmra.mxu1 %v2859_v13 }
 0x6b1   :  { %v2441_v37 = vpop.f32.mrf.mxu1 }
 0x6b3   :  { %v963_v38 = vpop.f32.mrf.mxu1 }
 0x6b4   :  { %2450 = vmatprep.mubr.msk.f32.mxu0 %vm349_vm0, %v963_v38  ;;  %v1812_v38 = vld [vmem:[#allocation10 + $0x70] sm:$0xff] }
 0x6b5   :  { %2451 = vmatmul.mubr.msk.f32.vlgmr.msra.gmra.mxu0 %vm349_vm0, %v2441_v37  ;;  %v1813_v37 = vld [vmem:[#allocation10 + $0x78] sm:$0xff] }
 0x6b6   :  { %2465 = vmatpush3.xpose.msra.mxu0 %v1141_v35  ;;  %2472 = vmatprep.mubr.f32.mxu0 %v2854_v8 }
 0x6b7   :  { %2466 = vmatprep.subr.mxu0 %v1140_v39 }
 0x6b9   :  { %v2910_v42 = vpop.f32.mrf.mxu1 }
 0x6ba   :  { %2467 = vmatpush3.xpose.msra.mxu0 %v1140_v39  ;;  %v1811_v39 = vld [vmem:[#allocation10 + $0x68] sm:$0xff] }
 0x6bb   :  { %2468 = vmatprep.subr.mxu0 %v1139_v40  ;;  %v2912_v43 = vpop.f32.mrf.mxu1 }
 0x6be   :  { %2469 = vmatpush3.xpose.msra.mxu0 %v1139_v40  ;;  %v1810_v40 = vld [vmem:[#allocation10 + $0x60] sm:$0xff] }
 0x6bf   :  { %2470 = vmatprep.subr.mxu0 %v1138_v41 }
 0x6c2   :  { %2471 = vmatpush3.xpose.msra.mxu0 %v1138_v41 }
 0x6c3   :  { %2486 = vmatprep.subr.mxu0 %v1299_v50 }
 0x6c5   :  { %2473 = vmatmul.mubr.f32.vlgmr.msra.gmra.mxu0 %v2857_v12 }
 0x6c6   :  { %2494 = vmatprep.mubr.f32.mxu0 %v2851_v4  ;;  %2487 = vmatpush3.xpose.msra.mxu0 %v1299_v50 }
 0x6c7   :  { %2488 = vmatprep.subr.mxu0 %v1298_v51 }
 0x6c9   :  { %v2485_v44 = vpop.f32.mrf.mxu1 }
 0x6ca   :  { %2497 = vmatprep.subr.msk.mxu1 %vm349_vm0, %v2485_v44  ;;  %2489 = vmatpush3.xpose.msra.mxu0 %v1298_v51 }
 0x6cb   :  { %2498 = vmatpush3.xpose.msk.msra.mxu1 %vm349_vm0, %v2485_v44  ;;  %v1287_v45 = vpop.f32.mrf.mxu1  ;;  %2490 = vmatprep.subr.mxu0 %v1297_v52 }
 0x6cc   :  { %2499 = vmatprep.subr.msk.mxu1 %vm349_vm0, %v1287_v45 }
 0x6ce   :  { %2491 = vmatpush3.xpose.msra.mxu0 %v1297_v52 }
 0x6cf   :  { %2500 = vmatpush3.xpose.msk.msra.mxu1 %vm349_vm0, %v1287_v45  ;;  %2492 = vmatprep.subr.mxu0 %v1296_v53 }
 0x6d2   :  { %2493 = vmatpush3.xpose.msra.mxu0 %v1296_v53 }
 0x6d3   :  { %2522 = vmatprep.subr.mxu0 %v1655_v20 }
 0x6d5   :  { %2495 = vmatmul.mubr.f32.vlgmr.msra.gmra.mxu0 %v2859_v13 }
 0x6d6   :  { %2530 = vmatprep.mubr.f32.mxu0 %v2854_v8  ;;  %2523 = vmatpush3.xpose.msra.mxu0 %v1655_v20 }
 0x6d7   :  { %2524 = vmatprep.subr.mxu0 %v1654_v21 }
 0x6da   :  { %2525 = vmatpush3.xpose.msra.mxu0 %v1654_v21 }
 0x6db   :  { %2526 = vmatprep.subr.mxu0 %v1653_v22 }
 0x6de   :  { %2527 = vmatpush3.xpose.msra.mxu0 %v1653_v22 }
 0x6df   :  { %2528 = vmatprep.subr.mxu0 %v1652_v23 }
 0x6e2   :  { %2529 = vmatpush3.xpose.msra.mxu0 %v1652_v23 }
 0x6e3   :  { %2544 = vmatprep.subr.mxu0 %v1813_v37 }
 0x6e5   :  { %2531 = vmatmul.mubr.f32.vlgmr.msra.gmra.mxu0 %v2857_v12 }
 0x6e6   :  { %2552 = vmatprep.mubr.f32.mxu0 %v2851_v4  ;;  %2545 = vmatpush3.xpose.msra.mxu0 %v1813_v37 }
 0x6e7   :  { %2546 = vmatprep.subr.mxu0 %v1812_v38 }
 0x6ea   :  { %2547 = vmatpush3.xpose.msra.mxu0 %v1812_v38 }
 0x6eb   :  { %2548 = vmatprep.subr.mxu0 %v1811_v39 }
 0x6ee   :  { %2549 = vmatpush3.xpose.msra.mxu0 %v1811_v39 }
 0x6ef   :  { %2550 = vmatprep.subr.mxu0 %v1810_v40 }
 0x6f2   :  { %2551 = vmatpush3.xpose.msra.mxu0 %v1810_v40 }
 0x6f5   :  { %2553 = vmatmul.mubr.f32.vlgmr.msra.gmra.mxu0 %v2859_v13 }
 0x775   :  { %v2918_v46 = vpop.f32.mrf.mxu0 }
 0x776   :  { %v1135_v30 = vadd.f32 %v2910_v42, %v2918_v46 }
 0x777   :  { %v2920_v47 = vpop.f32.mrf.mxu0 }
 0x785   :  { %v2474_v48 = vpop.f32.mrf.mxu0 }
 0x787   :  { %v1208_v49 = vpop.f32.mrf.mxu0 }
 0x788   :  { %2501 = vmatprep.mubr.msk.f32.mxu1 %vm349_vm0, %v1208_v49 }
 0x789   :  { %2502 = vmatmul.mubr.msk.f32.vlgmr.msra.gmra.mxu1 %vm349_vm0, %v2474_v48 }
 0x795   :  { %v2496_v3 = vpop.f32.mrf.mxu0 }
 0x796   :  { %2504 = vmatprep.subr.mxu1 %v2496_v3 }
 0x797   :  { %v1366_v5 = vpop.f32.mrf.mxu0  ;;  %2505 = vmatpush3.msra.mxu1 %v2496_v3 }
 0x798   :  { %2506 = vmatprep.subr.mxu1 %v1366_v5 }
 0x799   :  { %2507 = vmatpush3.msra.mxu1 %v1366_v5 }
 0x79a   :  { %2511 = vmatprep.subr.mxu1 %v1568_v6 }
 0x7a5   :  { %v2532_v12 = vpop.f32.mrf.mxu0 }
 0x7a7   :  { %v1722_v29 = vpop.f32.mrf.mxu0 }
 0x849   :  { %v2503_v54 = vpop.f32.mrf.mxu1 }
 0x84a   :  { %v1465_v55 = vsel %vm437_vm1, %v2503_v54, -inf }
 0x84b   :  { %1466 = vmax.xlane.f32.xlu1 %v1465_v55  ;;  %v1453_v56 = vpop.f32.mrf.mxu1 }
 0x84c   :  { %v1462_v57 = vsel %vm437_vm1, %v1453_v56, -inf }
 0x84d   :  { %1463 = vmax.xlane.f32.xlu0 %v1462_v57  ;;  %v2081_v57 = vld [vmem:[#allocation11 + $0x70] sm:$0xff] }
 0x8d4   :  { %v1467_v58 = vpop.xlane.xlu1 %1466 }
 0x8d5   :  { %v1469_v59 = vsub.f32 %v2503_v54, %v1467_v58  ;;  %v2554_v54 = vpop.f32.mrf.mxu0 }
 0x8d6   :  { %v1464_v60 = vpop.xlane.xlu0 %1463 }
 0x8d7   :  { %v1472_v61 = vmul.f32 1.442695, %v1469_v59  ;;  %v1468_v62 = vsub.f32 %v1453_v56, %v1464_v60  ;;  %v1880_v55 = vpop.f32.mrf.mxu0  ;;  %v2082_v56 = vld [vmem:[#allocation11 + $0x78] sm:$0xff] }
 0x8d8   :  { %2569 = vmatprep.subr.mxu0 %v2082_v56 }
 0x8d9   :  { %2605 = vpow2.f32 %v1472_v61  ;;  %v1470_v63 = vmul.f32 1.442695, %v1468_v62  ;;  %2570 = vmatpush3.msra.mxu0 %v2082_v56 }
 0x8da   :  { %2571 = vmatprep.subr.mxu0 %v2081_v57 }
 0x8db   :  { %2607 = vpow2.f32 %v1470_v63  ;;  %2572 = vmatpush3.msra.mxu0 %v2081_v57 }
 0x8e6   :  { %v2606_v0 = vpop.eup %2605 }
 0x8e7   :  { %v1477_v1 = vsel %vm437_vm1, %v2606_v0, 0.0 }
 0x8e8   :  { %v2608_v8 = vpop.eup %2607  ;;  %1478 = vadd.xlane.f32.xlu1 %v1477_v1  ;;  %v2079_v1 = vld [vmem:[#allocation11 + $0x60] sm:$0xff] }
 0x8e9   :  { %v1474_v2 = vsel %vm437_vm1, %v2608_v8, 0.0 }
 0x8ea   :  { %1475 = vadd.xlane.f32.xlu0 %v1474_v2 }
 0x971   :  { %v1479_v7 = vpop.xlane.xlu1 %1478 }
 0x972   :  { %2609 = vrcp.f32 %v1479_v7 }
 0x973   :  { %v1476_v9 = vpop.xlane.xlu0 %1475 }
 0x974   :  { %2611 = vrcp.f32 %v1476_v9 }
 0x97f   :  { %v2610_v10 = vpop.eup %2609 }
 0x980   :  { %v1483_v15 = vmul.f32 %v2610_v10, %v2606_v0  ;;  %v2080_v0 = vld [vmem:[#allocation11 + $0x68] sm:$0xff] }
 0x981   :  { %v2612_v11 = vpop.eup %2611  ;;  %2573 = vmatprep.subr.mxu0 %v2080_v0 }
 0x982   :  { %v1482_v14 = vmul.f32 %v2612_v11, %v2608_v8  ;;  %2574 = vmatpush3.msra.mxu0 %v2080_v0 }
 0x983   :  { %2575 = vmatprep.subr.mxu0 %v2079_v1 }
 0x984   :  { %2508 = vmatprep.mubr.msk.f32.mxu1 %vm437_vm1, %v1482_v14  ;;  %2576 = vmatpush3.msra.mxu0 %v2079_v1 }
 0x985   :  { %2509 = vmatmul.mubr.msk.f32.vlgmr.msra.gmra.mxu1 %vm437_vm1, %v1483_v15 }
 0x986   :  { %2512 = vmatpush3.msra.mxu1 %v1568_v6 }
 0x987   :  { %2513 = vmatprep.subr.mxu1 %v1567_v16 }
 0x988   :  { %2514 = vmatpush3.msra.mxu1 %v1567_v16 }
 0x989   :  { %2515 = vmatprep.subr.mxu1 %v1566_v17 }
 0x98a   :  { %2516 = vmatpush3.msra.mxu1 %v1566_v17 }
 0x98b   :  { %2517 = vmatprep.subr.mxu1 %v1565_v18 }
 0x98c   :  { %2518 = vmatpush3.msra.mxu1 %v1565_v18 }
 0x98d   :  { %2533 = vmatprep.subr.mxu1 %v1734_v19 }
 0xa45   :  { %v2510_v24 = vpop.f32.mrf.mxu1 }
 0xa47   :  { %v1556_v25 = vpop.f32.mrf.mxu1 }
 0xa48   :  { %2519 = vmatprep.mubr.msk.f32.mxu1 %vm349_vm0, %v1556_v25 }
 0xa49   :  { %2520 = vmatmul.mubr.msk.f32.vlgmr.msra.gmra.mxu1 %vm349_vm0, %v2510_v24 }
 0xa4a   :  { %2534 = vmatpush3.xpose.msra.mxu1 %v1734_v19  ;;  %2541 = vmatprep.mubr.f32.mxu1 %v2851_v4  ;;  %v1130_v4 = vadd.f32 %v2912_v43, %v2920_v47 }
 0xa4b   :  { %2535 = vmatprep.subr.mxu1 %v1733_v26 }
 0xa4e   :  { %2536 = vmatpush3.xpose.msra.mxu1 %v1733_v26 }
 0xa4f   :  { %2537 = vmatprep.subr.mxu1 %v1732_v27 }
 0xa52   :  { %2538 = vmatpush3.xpose.msra.mxu1 %v1732_v27 }
 0xa53   :  { %2539 = vmatprep.subr.mxu1 %v1731_v28 }
 0xa56   :  { %2540 = vmatpush3.xpose.msra.mxu1 %v1731_v28 }
 0xa59   :  { %2542 = vmatmul.mubr.f32.vlgmr.msra.gmra.mxu1 %v2859_v13 }
 0xa5a   :  { %2559 = vmatprep.mubr.msk.f32.mxu1 %vm349_vm0, %v1722_v29 }
 0xb09   :  { %v2521_v31 = vpop.f32.mrf.mxu1 }
 0xb0a   :  { %v2943_v32 = vadd.f32 %v2521_v31, %v1135_v30 }
 0xb0b   :  { %v1641_v33 = vpop.f32.mrf.mxu1 }
 0xb0c   :  { %v2945_v34 = vadd.f32 %v1641_v33, %v1130_v4 }
 0xb19   :  { %v2543_v35 = vpop.f32.mrf.mxu1 }
 0xb1a   :  { %2555 = vmatprep.subr.msk.mxu1 %vm349_vm0, %v2543_v35 }
 0xb1b   :  { %v1801_v36 = vpop.f32.mrf.mxu1  ;;  %2556 = vmatpush3.xpose.msk.msra.mxu1 %vm349_vm0, %v2543_v35 }
 0xb1c   :  { %2557 = vmatprep.subr.msk.mxu1 %vm349_vm0, %v1801_v36 }
 0xb1f   :  { %2558 = vmatpush3.xpose.msk.msra.mxu1 %vm349_vm0, %v1801_v36 }
 0xb20   :  { %2562 = vmatprep.subr.mxu1 %v2554_v54 }
 0xb22   :  { %2560 = vmatmul.mubr.msk.f32.vlgmr.msra.gmra.mxu1 %vm349_vm0, %v2532_v12 }
 0xb23   :  { %2563 = vmatpush3.msra.mxu1 %v2554_v54 }
 0xb24   :  { %2564 = vmatprep.subr.mxu1 %v1880_v55 }
 0xb25   :  { %2565 = vmatpush3.msra.mxu1 %v1880_v55 }
 0xbe2   :  { %v2561_v41 = vpop.f32.mrf.mxu1 }
 0xbe3   :  { %v1979_v42 = vsel %vm437_vm1, %v2561_v41, -inf }
 0xbe4   :  { %1980 = vmax.xlane.f32.xlu1 %v1979_v42  ;;  %v1967_v43 = vpop.f32.mrf.mxu1 }
 0xbe5   :  { %v1976_v44 = vsel %vm437_vm1, %v1967_v43, -inf }
 0xbe6   :  { %1977 = vmax.xlane.f32.xlu0 %v1976_v44 }
 0xc6d   :  { %v1981_v45 = vpop.xlane.xlu1 %1980 }
 0xc6e   :  { %v1983_v46 = vsub.f32 %v2561_v41, %v1981_v45 }
 0xc6f   :  { %v1978_v47 = vpop.xlane.xlu0 %1977 }
 0xc70   :  { %v1986_v48 = vmul.f32 1.442695, %v1983_v46  ;;  %v1982_v49 = vsub.f32 %v1967_v43, %v1978_v47 }
 0xc72   :  { %2613 = vpow2.f32 %v1986_v48  ;;  %v1984_v50 = vmul.f32 1.442695, %v1982_v49 }
 0xc74   :  { %2615 = vpow2.f32 %v1984_v50 }
 0xc7f   :  { %v2614_v51 = vpop.eup %2613 }
 0xc80   :  { %v1991_v52 = vsel %vm437_vm1, %v2614_v51, 0.0 }
 0xc81   :  { %v2616_v13 = vpop.eup %2615  ;;  %1992 = vadd.xlane.f32.xlu1 %v1991_v52 }
 0xc82   :  { %v1988_v53 = vsel %vm437_vm1, %v2616_v13, 0.0 }
 0xc83   :  { %1989 = vadd.xlane.f32.xlu0 %v1988_v53 }
 0xd0a   :  { %v1993_v58 = vpop.xlane.xlu1 %1992 }
 0xd0b   :  { %2617 = vrcp.f32 %v1993_v58 }
 0xd0c   :  { %v1990_v59 = vpop.xlane.xlu0 %1989 }
 0xd0d   :  { %2619 = vrcp.f32 %v1990_v59 }
 0xd18   :  { %v2618_v60 = vpop.eup %2617 }
 0xd19   :  { %v1997_v63 = vmul.f32 %v2618_v60, %v2614_v51 }
 0xd1a   :  { %v2620_v61 = vpop.eup %2619 }
 0xd1b   :  { %v1996_v62 = vmul.f32 %v2620_v61, %v2616_v13 }
 0xd1d   :  { %2566 = vmatprep.mubr.msk.f32.mxu1 %vm437_vm1, %v1996_v62 }
 0xd1e   :  { %2567 = vmatmul.mubr.msk.f32.vlgmr.msra.gmra.mxu1 %vm437_vm1, %v1997_v63 }
 0xdde   :  { %v2568_v8 = vpop.f32.mrf.mxu1 }
 0xde0   :  { %v2070_v2 = vpop.f32.mrf.mxu1 }
 0xde1   :  { %2577 = vmatprep.mubr.msk.f32.mxu0 %vm349_vm0, %v2070_v2 }
 0xde2   :  { %2578 = vmatmul.mubr.msk.f32.vlgmr.msra.gmra.mxu0 %vm349_vm0, %v2568_v8 }
 0xea2   :  { %v2579_v3 = vpop.f32.mrf.mxu0 }
 0xea3   :  { %v2165_v5 = vadd.f32 %v2579_v3, %v2943_v32 }
 0xea4   :  { %v2155_v6 = vpop.f32.mrf.mxu0 }
 0xea5   :  { %2167 = vst [vmem:[#allocation13 + $0x8] sm:$0xff] %v2165_v5  ;;  %v2164_v7 = vadd.f32 %v2155_v6, %v2945_v34 }
 0xea7   :  { %2166 = vst [vmem:[#allocation13] sm:$0xff] %v2164_v7 }
 0xea8   :  { %2752 = shalt.err (!%p2749_p6)
}
 0xea9   :  { %2179 = dma.vmem_to_hbm [thread:$0]  %s2174_s5, 256, %s2975_s6, [#allocation4], %s2773_s26, %s2773_s26, %s2774_s27  }
 0xeaa   :  { %2769 = dma.done.wait [#allocation4], 256  }
 0xeab   :  { %2770 = vsyncadd [#allocation4], 4294967040 }
 0xeac   :  { %2183 = vsyncpa [#allocation3], 1 }
 0xead   :  { %2184 = vsyncpa [#allocation6], 1 }
 0xeae   :  { %2185 = vsyncpa [#allocation9], 1 }
 0xeaf   :  { %2186 = vsyncpa [#allocation12], 1 }
 0xeb0   :  { %2187 = vsyncpa [#allocation4], 1 }

</bundles_post_ra>
